<compile_context>
chip_gen: v5e
topology: v5e:2x2
jax: 0.10.0
libtpu: 0.0.40
codegen_flags: <defaults>
</compile_context>

<pallas_src>
import jax
import jax.numpy as jnp
from jax.experimental import pallas as pl
from jax.experimental.pallas import tpu as pltpu

EPS = 1e-5


def _pick_time_tile(T: int, target: int = 1024) -> int:
    """Largest tile <= target that divides T and keeps sublane alignment."""
    if T <= target:
        return T
    for tt in range(target, 7, -1):
        if T % tt == 0 and tt % 8 == 0:
            return tt
    return T  # fallback: whole axis (no clean divisor found)


# ---------------------------------------------------------------------------
# Pass 1: per-(batch, channel) statistics over T (tiled reduction).
# ---------------------------------------------------------------------------
def _make_stats_kernel(T: int):
    inv_n = 1.0 / float(T)

    def stats_kernel(x_ref, mean_ref, std_ref, sum_ref, sumsq_ref):
        t = pl.program_id(1)

        @pl.when(t == 0)
        def _():
            sum_ref[...] = jnp.zeros_like(sum_ref)
            sumsq_ref[...] = jnp.zeros_like(sumsq_ref)

        x = x_ref[...].astype(jnp.float32)                 # (1, tT, C)
        sum_ref[...] += jnp.sum(x, axis=1, keepdims=True)  # (1, 1, C)
        sumsq_ref[...] += jnp.sum(x * x, axis=1, keepdims=True)

        @pl.when(t == pl.num_programs(1) - 1)
        def _():
            mean = sum_ref[...] * inv_n
            # population (unbiased=False) variance; clamp guards tiny negatives
            var = jnp.maximum(sumsq_ref[...] * inv_n - mean * mean, 0.0)
            std = jnp.sqrt(var + EPS)
            mean_ref[...] = mean
            std_ref[...] = std

    return stats_kernel


def revin_stats(x, *, time_tile=None):
    """x: (B, T, C) -> (mean, std), each (B, 1, C) float32."""
    B, T, C = x.shape
    tT = _pick_time_tile(T) if time_tile is None else time_tile
    nT = T // tT

    x_spec = pl.BlockSpec((1, tT, C), lambda b, t: (b, t, 0))
    stat_spec = pl.BlockSpec((1, 1, C), lambda b, t: (b, 0, 0))

    return pl.pallas_call(
        _make_stats_kernel(T),
        out_shape=(
            jax.ShapeDtypeStruct((B, 1, C), jnp.float32),
            jax.ShapeDtypeStruct((B, 1, C), jnp.float32),
        ),
        grid_spec=pltpu.PrefetchScalarGridSpec(
            num_scalar_prefetch=0,
            grid=(B, nT),
            in_specs=[x_spec],
            out_specs=[stat_spec, stat_spec],
            scratch_shapes=[
                pltpu.VMEM((1, 1, C), jnp.float32),
                pltpu.VMEM((1, 1, C), jnp.float32),
            ],
        ),
        compiler_params=pltpu.CompilerParams(
            dimension_semantics=("parallel", "arbitrary")),
    )(x)


# ---------------------------------------------------------------------------
# Pass 2: normalize -- y = x * scale + shift, scale/shift folded per channel.
# ---------------------------------------------------------------------------
def _apply_norm_kernel(x_ref, w_ref, b_ref, mean_ref, std_ref, y_ref):
    w = w_ref[...]                     # (1, 1, C) f32
    b = b_ref[...]
    mean = mean_ref[...]
    std = std_ref[...]
    inv_std = 1.0 / std                # channel-sized; negligible cost
    scale = w * inv_std                # (x - mean)/std * w + b
    shift = b - mean * scale           #   == x*scale + shift
    x = x_ref[...].astype(jnp.float32)
    y_ref[...] = (x * scale + shift).astype(y_ref.dtype)


def revin_apply_norm(x, weight, bias, mean, std, *, time_tile=None):
    B, T, C = x.shape
    tT = _pick_time_tile(T) if time_tile is None else time_tile
    nT = T // tT

    w3 = weight.reshape(1, 1, C).astype(jnp.float32)
    b3 = bias.reshape(1, 1, C).astype(jnp.float32)

    full_spec = pl.BlockSpec((1, tT, C), lambda b, t: (b, t, 0))
    param_spec = pl.BlockSpec((1, 1, C), lambda b, t: (0, 0, 0))
    stat_spec = pl.BlockSpec((1, 1, C), lambda b, t: (b, 0, 0))

    return pl.pallas_call(
        _apply_norm_kernel,
        out_shape=jax.ShapeDtypeStruct((B, T, C), x.dtype),
        grid_spec=pltpu.PrefetchScalarGridSpec(
            num_scalar_prefetch=0,
            grid=(B, nT),
            in_specs=[full_spec, param_spec, param_spec, stat_spec, stat_spec],
            out_specs=full_spec,
        ),
        compiler_params=pltpu.CompilerParams(
            dimension_semantics=("parallel", "parallel")),
    )(x, w3, b3, mean, std)


def revin_norm(x, weight, bias):
    """RevIN 'norm' mode. x: (B, T, C); weight, bias: (C,).
    Returns (y, mean, std) -- stats saved for later 'denorm'."""
    mean, std = revin_stats(x)
    y = revin_apply_norm(x, weight, bias, mean, std)
    return y, mean, std


# ---------------------------------------------------------------------------
# Denorm: x = y * (std / (w + eps^2)) + (mean - b * std / (w + eps^2))
# ---------------------------------------------------------------------------
def _denorm_kernel(y_ref, w_ref, b_ref, mean_ref, std_ref, x_ref):
    w = w_ref[...]
    b = b_ref[...]
    mean = mean_ref[...]
    std = std_ref[...]
    inv_w = 1.0 / (w + EPS * EPS)      # channel-sized reciprocal, not per-elem
    scale = std * inv_w
    shift = mean - b * scale
    y = y_ref[...].astype(jnp.float32)
    x_ref[...] = (y * scale + shift).astype(x_ref.dtype)


def revin_denorm(y, weight, bias, mean, std, *, time_tile=None):
    """RevIN 'denorm' mode. y: (B, T, C); weight, bias: (C,); mean/std: (B,1,C)."""
    B, T, C = y.shape
    tT = _pick_time_tile(T) if time_tile is None else time_tile
    nT = T // tT

    w3 = weight.reshape(1, 1, C).astype(jnp.float32)
    b3 = bias.reshape(1, 1, C).astype(jnp.float32)

    full_spec = pl.BlockSpec((1, tT, C), lambda b, t: (b, t, 0))
    param_spec = pl.BlockSpec((1, 1, C), lambda b, t: (0, 0, 0))
    stat_spec = pl.BlockSpec((1, 1, C), lambda b, t: (b, 0, 0))

    return pl.pallas_call(
        _denorm_kernel,
        out_shape=jax.ShapeDtypeStruct((B, T, C), y.dtype),
        grid_spec=pltpu.PrefetchScalarGridSpec(
            num_scalar_prefetch=0,
            grid=(B, nT),
            in_specs=[full_spec, param_spec, param_spec, stat_spec, stat_spec],
            out_specs=full_spec,
        ),
        compiler_params=pltpu.CompilerParams(
            dimension_semantics=("parallel", "parallel")),
    )(y, w3, b3, mean, std)


# ---------------------------------------------------------------------------
# Pure-JAX references (mirror PyTorch RevIN exactly).
# ---------------------------------------------------------------------------
def _ref_norm(x, weight, bias):
    mean = jnp.mean(x, axis=1, keepdims=True)
    var = jnp.var(x, axis=1, keepdims=True)
    std = jnp.sqrt(var + EPS)
    y = (x - mean) / std
    y = y * weight.reshape(1, 1, -1) + bias.reshape(1, 1, -1)
    return y, mean, std


def _ref_denorm(y, weight, bias, mean, std):
    x = y - bias.reshape(1, 1, -1)
    x = x / (weight.reshape(1, 1, -1) + EPS * EPS)
    x = x * std + mean
    return x


if __name__ == "__main__":
    key = jax.random.PRNGKey(0)
    B, T, C = 2, 16, 8          # batch, seq_len, num_features
    x = jax.random.normal(key, (B, T, C), dtype=jnp.float32) * 3.0 + 1.5

    # Deterministic parameter init, matching RevIN._init_params:
    # affine_weight = ones(C), affine_bias = zeros(C)
    affine_weight = jnp.ones((C,), dtype=jnp.float32)
    affine_bias = jnp.zeros((C,), dtype=jnp.float32)

    # 'norm' mode
    y, mean, std = revin_norm(x, affine_weight, affine_bias)
    y = jax.block_until_ready(y)

    # 'denorm' mode (reverses the normalization using saved statistics)
    x_rec = revin_denorm(y, affine_weight, affine_bias, mean, std)
    x_rec = jax.block_until_ready(x_rec)

    # Verify against pure-JAX reference
    y_ref, mean_ref, std_ref = _ref_norm(x, affine_weight, affine_bias)
    x_rec_ref = _ref_denorm(y_ref, affine_weight, affine_bias, mean_ref, std_ref)

    assert jnp.allclose(mean, mean_ref, atol=1e-5, rtol=1e-5)
    assert jnp.allclose(std, std_ref, atol=1e-5, rtol=1e-5)
    assert jnp.allclose(y, y_ref, atol=1e-5, rtol=1e-5)
    assert jnp.allclose(x_rec, x_rec_ref, atol=1e-5, rtol=1e-5)
    assert jnp.allclose(x_rec, x, atol=1e-4, rtol=1e-4)  # round-trip recovers input

    print("KERNEL_OK")
</pallas_src>

<mosaic_0001>
module attributes {stable_mosaic.version = 11 : i64} {
  func.func @stats_kernel(%arg0: i32, %arg1: i32, %arg2: memref<1x16x8xf32, #tpu.memory_space<vmem>>, %arg3: memref<1x1x8xf32, #tpu.memory_space<vmem>>, %arg4: memref<1x1x8xf32, #tpu.memory_space<vmem>>, %arg5: memref<1x1x8xf32, #tpu.memory_space<vmem>>, %arg6: memref<1x1x8xf32, #tpu.memory_space<vmem>>) attributes {dimension_semantics = [#tpu.dimension_semantics<parallel>, #tpu.dimension_semantics<arbitrary>], iteration_bounds = array<i64: 2, 1>, scalar_prefetch = 0 : i64, scratch_operands = 2 : i64, tpu.core_type = #tpu.core_type<tc>, window_params = [{transform_indices = @transform_0, window_bounds = array<i64: 1, 16, 8>}, {transform_indices = @transform_1, window_bounds = array<i64: 1, 1, 8>}, {transform_indices = @transform_2, window_bounds = array<i64: 1, 1, 8>}]} {
    %c0_i32 = arith.constant 0 : i32
    %0 = arith.cmpi eq, %arg1, %c0_i32 : i32
    %1 = arith.extui %0 : i1 to i32
    %c0_i32_0 = arith.constant 0 : i32
    %2 = arith.cmpi ne, %1, %c0_i32_0 : i32
    scf.if %2 {
      %cst_18 = arith.constant 0.000000e+00 : f32
      %18 = vector.broadcast %cst_18 : f32 to vector<1x1x8xf32>
      %c0_19 = arith.constant 0 : index
      %c0_20 = arith.constant 0 : index
      %c0_21 = arith.constant 0 : index
      %19 = vector.load %arg5[%c0_19, %c0_20, %c0_21] : memref<1x1x8xf32, #tpu.memory_space<vmem>>, vector<1x1x8xf32>
      tpu.vector_store %arg5[%c0_19, %c0_20, %c0_21], %18 {strides = array<i32>} : memref<1x1x8xf32, #tpu.memory_space<vmem>>, vector<1x1x8xf32>,
      %cst_22 = arith.constant 0.000000e+00 : f32
      %20 = vector.broadcast %cst_22 : f32 to vector<1x1x8xf32>
      %c0_23 = arith.constant 0 : index
      %c0_24 = arith.constant 0 : index
      %c0_25 = arith.constant 0 : index
      %21 = vector.load %arg6[%c0_23, %c0_24, %c0_25] : memref<1x1x8xf32, #tpu.memory_space<vmem>>, vector<1x1x8xf32>
      tpu.vector_store %arg6[%c0_23, %c0_24, %c0_25], %20 {strides = array<i32>} : memref<1x1x8xf32, #tpu.memory_space<vmem>>, vector<1x1x8xf32>,
    } else {
    }
    %c0 = arith.constant 0 : index
    %c0_1 = arith.constant 0 : index
    %c0_2 = arith.constant 0 : index
    %3 = vector.load %arg2[%c0, %c0_1, %c0_2] : memref<1x16x8xf32, #tpu.memory_space<vmem>>, vector<1x16x8xf32>
    %c0_3 = arith.constant 0 : index
    %c0_4 = arith.constant 0 : index
    %c0_5 = arith.constant 0 : index
    %4 = vector.load %arg5[%c0_3, %c0_4, %c0_5] : memref<1x1x8xf32, #tpu.memory_space<vmem>>, vector<1x1x8xf32>
    %cst = arith.constant dense<0.000000e+00> : vector<1x8xf32>
    %5 = vector.multi_reduction <add>, %3, %cst [1] : vector<1x16x8xf32> to vector<1x8xf32>
    %6 = vector.shape_cast %5 : vector<1x8xf32> to vector<1x1x8xf32>
    %7 = arith.addf %4, %6 : vector<1x1x8xf32>
    %c0_6 = arith.constant 0 : index
    %c0_7 = arith.constant 0 : index
    %c0_8 = arith.constant 0 : index
    %8 = vector.load %arg5[%c0_6, %c0_7, %c0_8] : memref<1x1x8xf32, #tpu.memory_space<vmem>>, vector<1x1x8xf32>
    tpu.vector_store %arg5[%c0_6, %c0_7, %c0_8], %7 {strides = array<i32>} : memref<1x1x8xf32, #tpu.memory_space<vmem>>, vector<1x1x8xf32>,
    %c0_9 = arith.constant 0 : index
    %c0_10 = arith.constant 0 : index
    %c0_11 = arith.constant 0 : index
    %9 = vector.load %arg6[%c0_9, %c0_10, %c0_11] : memref<1x1x8xf32, #tpu.memory_space<vmem>>, vector<1x1x8xf32>
    %10 = arith.mulf %3, %3 : vector<1x16x8xf32>
    %cst_12 = arith.constant dense<0.000000e+00> : vector<1x8xf32>
    %11 = vector.multi_reduction <add>, %10, %cst_12 [1] : vector<1x16x8xf32> to vector<1x8xf32>
    %12 = vector.shape_cast %11 : vector<1x8xf32> to vector<1x1x8xf32>
    %13 = arith.addf %9, %12 : vector<1x1x8xf32>
    %c0_13 = arith.constant 0 : index
    %c0_14 = arith.constant 0 : index
    %c0_15 = arith.constant 0 : index
    %14 = vector.load %arg6[%c0_13, %c0_14, %c0_15] : memref<1x1x8xf32, #tpu.memory_space<vmem>>, vector<1x1x8xf32>
    tpu.vector_store %arg6[%c0_13, %c0_14, %c0_15], %13 {strides = array<i32>} : memref<1x1x8xf32, #tpu.memory_space<vmem>>, vector<1x1x8xf32>,
    %c0_i32_16 = arith.constant 0 : i32
    %15 = arith.cmpi eq, %arg1, %c0_i32_16 : i32
    %16 = arith.extui %15 : i1 to i32
    %c0_i32_17 = arith.constant 0 : i32
    %17 = arith.cmpi ne, %16, %c0_i32_17 : i32
    scf.if %17 {
      %c0_18 = arith.constant 0 : index
      %c0_19 = arith.constant 0 : index
      %c0_20 = arith.constant 0 : index
      %18 = vector.load %arg5[%c0_18, %c0_19, %c0_20] : memref<1x1x8xf32, #tpu.memory_space<vmem>>, vector<1x1x8xf32>
      %cst_21 = arith.constant 6.250000e-02 : f32
      %19 = vector.broadcast %cst_21 : f32 to vector<1x1x8xf32>
      %20 = arith.mulf %18, %19 : vector<1x1x8xf32>
      %c0_22 = arith.constant 0 : index
      %c0_23 = arith.constant 0 : index
      %c0_24 = arith.constant 0 : index
      %21 = vector.load %arg6[%c0_22, %c0_23, %c0_24] : memref<1x1x8xf32, #tpu.memory_space<vmem>>, vector<1x1x8xf32>
      %cst_25 = arith.constant 6.250000e-02 : f32
      %22 = vector.broadcast %cst_25 : f32 to vector<1x1x8xf32>
      %23 = arith.mulf %21, %22 : vector<1x1x8xf32>
      %24 = arith.mulf %20, %20 : vector<1x1x8xf32>
      %25 = arith.subf %23, %24 : vector<1x1x8xf32>
      %cst_26 = arith.constant 0.000000e+00 : f32
      %26 = vector.broadcast %cst_26 : f32 to vector<1x1x8xf32>
      %27 = arith.maximumf %25, %26 : vector<1x1x8xf32>
      %cst_27 = arith.constant 9.99999974E-6 : f32
      %28 = vector.broadcast %cst_27 : f32 to vector<1x1x8xf32>
      %29 = arith.addf %27, %28 : vector<1x1x8xf32>
      %30 = math.sqrt %29 : vector<1x1x8xf32>
      %c0_28 = arith.constant 0 : index
      %c0_29 = arith.constant 0 : index
      %c0_30 = arith.constant 0 : index
      %31 = vector.load %arg3[%c0_28, %c0_29, %c0_30] : memref<1x1x8xf32, #tpu.memory_space<vmem>>, vector<1x1x8xf32>
      tpu.vector_store %arg3[%c0_28, %c0_29, %c0_30], %20 {strides = array<i32>} : memref<1x1x8xf32, #tpu.memory_space<vmem>>, vector<1x1x8xf32>,
      %c0_31 = arith.constant 0 : index
      %c0_32 = arith.constant 0 : index
      %c0_33 = arith.constant 0 : index
      %32 = vector.load %arg4[%c0_31, %c0_32, %c0_33] : memref<1x1x8xf32, #tpu.memory_space<vmem>>, vector<1x1x8xf32>
      tpu.vector_store %arg4[%c0_31, %c0_32, %c0_33], %30 {strides = array<i32>} : memref<1x1x8xf32, #tpu.memory_space<vmem>>, vector<1x1x8xf32>,
    } else {
    }
    return
  }
  func.func @transform_0(%arg0: i32, %arg1: i32) -> (i32, i32, i32) {
    %c0_i32 = arith.constant 0 : i32
    %c0_i32_0 = arith.constant 0 : i32
    return %arg0, %arg1, %c0_i32 : i32, i32, i32
  }
  func.func @transform_1(%arg0: i32, %arg1: i32) -> (i32, i32, i32) {
    %c0_i32 = arith.constant 0 : i32
    %c0_i32_0 = arith.constant 0 : i32
    %c0_i32_1 = arith.constant 0 : i32
    return %arg0, %c0_i32, %c0_i32_0 : i32, i32, i32
  }
  func.func @transform_2(%arg0: i32, %arg1: i32) -> (i32, i32, i32) {
    %c0_i32 = arith.constant 0 : i32
    %c0_i32_0 = arith.constant 0 : i32
    %c0_i32_1 = arith.constant 0 : i32
    return %arg0, %c0_i32, %c0_i32_0 : i32, i32, i32
  }
}

</mosaic_0001>

<bundles_post_ra>
// kernel: tpu_custom_call.1
= control target key start
LH: loop header
LB: loop body
LE: loop exit
PB: predicated region body
PF: predicated region fallthrough
CT: control target
= control target key end

     0   :  { %8 = vsyncpa [#allocation5], 0  ;;  %s692_s0 = inlined_call_operand.vmem [shape: f32[2,16,8], index: 0, kind: input, shape index: {}]   ;;  %s693_s1 = inlined_call_operand.hbm [shape: f32[2,1,8], index: 1, kind: output, shape index: {0}]   ;;  %s694_s2 = inlined_call_operand.hbm [shape: f32[2,1,8], index: 2, kind: output, shape index: {1}]  }
   0x1   :  { %10 = vsyncpa [#allocation5 + $0x1], 0 }
   0x2   :  { %11 = vsyncpa [#allocation7], 0 }
   0x3   :  { %13 = vsyncpa [#allocation7 + $0x1], 0  ;;  %s569_s9 = smov 0   ;;  %s571_s10 = smov 0  }
   0x4   :  { %s573_s11 = smov 0   ;;  %s575_s12 = smov 0  }
   0x5   :  { %s577_s13 = smov 0   ;;  %s579_s14 = smov 0  }
   0x6 LB: > { %s368_s15 = sadd.s32 4294967295, %s551_s14   ;;  %s369_s16 = sadd.s32 4294967294, %s551_s14   ;;  %s551_s14 = sphi %s579_s14, %s19_s14   ;;  %s547_s13 = sphi %s577_s13, %s701_s13   ;;  %s543_s12 = sphi %s575_s12, %s700_s12   ;;  %s539_s11 = sphi %s573_s11, %s699_s11   ;;  %s535_s10 = sphi %s571_s10, %s698_s10   ;;  %s531_s9 = sphi %s569_s9, %s697_s9  }
   0x7   : > { %s31_s17 = sadd.s32 1, %s547_s13  ;;  %s66_s18 = sadd.s32 1, %s539_s11 }
   0x8   : > { %p33_p0 = scmp.ge.s32.totalorder %s31_s17, 2  ;;  %p76_p1 = scmp.ne.s32.totalorder %s539_s11, %s535_s10 }
   0x9   : > { %p77_p2 = scmp.eq.s32.totalorder %s368_s15, 1  ;;  %p82_p3 = scmp.ne.s32.totalorder %s535_s10, %s531_s9 }
   0xa   : > { %s703_s17 = smov (%p33_p0, %s31_s17), 0  ;;  %p83_p5 = scmp.eq.s32.totalorder %s369_s16, 1 }
   0xb   : > { %p609_p4 = por %p77_p2, %p76_p1  ;;  %s63_s20 = ssub.s32 %s547_s13, %s703_s17 }
   0xc   : > { %p372_p6 = scmp.ge.s32.totalorder %s551_s14, 1  ;;  %p64_p7 = scmp.eq.s32.totalorder %s63_s20, 0 }
   0xd   : > { %p616_p8 = por %p83_p5, %p82_p3  ;;  %p140_p9 = scmp.lt.s32.totalorder %s551_s14, 3 }
   0xe   : > { %s622_s22 = scalar_select %p64_p7, %s539_s11, %s66_s18  }
   0xf   : > { %p141_p10 = pnand %p372_p6, %p140_p9 }
  0x10   : > { %p170_p11 = scmp.lt.s32.totalorder (!%p141_p10), %s543_s12, 1  ;;  %s633_s28 = sand.u32 (!%p141_p10), 1, %s535_s10  }
  0x11   : > { %144 = sbr.rel (%p141_p10) target bundleno = 86 (0x56), region = 24  ;;  %s254_s3 = scalar_lea.hbm (!%p141_p10), %s693_s1, %s543_s12 }
  0x12   : > { %s162_s4 = scalar_lea.vmem (!%p141_p10), [#allocation4], %s633_s28  ;;  %s258_s6 = sshll.u32 (!%p141_p10), %s254_s3, 4  ;;  %s259_s6 = int_to_ptr.hbm [resolvable:$true] %s258_s6 }
  0x13   : > { %s256_s5 = sshll.u32 (!%p141_p10), %s162_s4, 4  ;;  %s242_s7 = scalar_lea.sflag (!%p141_p10), [#allocation5], %s633_s28  ;;  %s257_s5 = int_to_ptr.vmem [resolvable:$true] %s256_s5 }
  0x14   : > { %s455_s8 = sshra.s32 (!%p141_p10), %s259_s6, 4  ;;  %s461_s20 = scalar_lea.hbm (!%p141_p10), %s693_s1, 2  ;;  %s456_s8 = int_to_ptr.hbm [resolvable:$true] %s455_s8 }
  0x15   : > { %s457_s15 = scalar_lea.hbm (!%p141_p10), %s456_s8, 1  ;;  %p462_p1 = scmp.lt.s32.totalorder (!%p141_p10), %s456_s8, %s693_s1 }
  0x16   : > { %vm183_vm0 = vcmask 57344   ;;  %v553_v0 = vmov 0.0   ;;  %s171_s23 = scalar_select %p170_p11, %s543_s12, 1  ;;  %vm189_vm1 = vcmask 64512  }
  0x17   : > { %184 = vst.msk [vmem:[#allocation2] sm:$0x1] %vm183_vm0, %v553_v0  ;;  %p458_p12 = scmp.ne.s32.totalorder %s456_s8, %s457_s15  ;;  %p463_p2 = scmp.lt.s32.totalorder %s461_s20, %s457_s15 }
  0x18   : > { %185 = vst.msk [vmem:[#allocation3] sm:$0x1] %vm183_vm0, %v553_v0  ;;  %s377_s24 = sshll.u32 %s171_s23, 4 }
  0x19   : > { %s177_s27 = scalar_lea.vmem %s692_s0, %s377_s24  ;;  %p459_p13 = pnand %p458_p12, %p609_p4 }
  0x1a   : > { %v186_v1 = vld [vmem:[%s177_s27] sm:$0xff]  ;;  %v187_v2 = vld [vmem:[%s177_s27 + $0x8] sm:$0xff]  ;;  %p464_p3 = por %p463_p2, %p462_p1 }
  0x1b   : > { %v190_v3 = vsel %vm189_vm1, %v186_v1, 0.0  ;;  %v191_v4 = vsel %vm189_vm1, %v187_v2, 0.0  ;;  %v203_v5 = vmul.f32 %v186_v1, %v186_v1  ;;  %v204_v6 = vmul.f32 %v187_v2, %v187_v2  ;;  %p460_p0 = pneg %p459_p13 }
  0x1c   : > { %v192_v7 = vadd.f32 %v191_v4, %v190_v3 }
  0x1d   : > { %v205_v8 = vsel %vm189_vm1, %v203_v5, 0.0  ;;  %v206_v9 = vsel %vm189_vm1, %v204_v6, 0.0  ;;  %p465_p5 = pnand %p464_p3, %p460_p0 }
  0x1e   : > { %v193_v10 = vrot.slane %v192_v7, 4  ;;  %v207_v11 = vadd.f32 %v206_v9, %v205_v8  ;;  %v188_v20 = vld [vmem:[#allocation2] sm:$0x1] }
  0x1f   : > { %v202_v23 = vld [vmem:[#allocation3] sm:$0x1] }
  0x20   : > { %v194_v12 = vadd.f32 %v193_v10, %v192_v7  ;;  %v208_v13 = vrot.slane %v207_v11, 4 }
  0x22   : > { %v195_v14 = vrot.slane %v194_v12, 2  ;;  %v209_v15 = vadd.f32 %v208_v13, %v207_v11 }
  0x24   : > { %v196_v16 = vadd.f32 %v195_v14, %v194_v12  ;;  %v210_v17 = vrot.slane %v209_v15, 2 }
  0x26   : > { %v197_v18 = vrot.slane %v196_v16, 1  ;;  %v211_v19 = vadd.f32 %v210_v17, %v209_v15 }
  0x28   : > { %v198_v21 = vadd.f32 %v197_v18, %v196_v16  ;;  %v212_v22 = vrot.slane %v211_v19, 1 }
  0x2a   : > { %v199_v24 = vadd.f32 %v198_v21, %v188_v20  ;;  %v213_v25 = vadd.f32 %v212_v22, %v211_v19 }
  0x2c   : > { %201 = vst.msk [vmem:[#allocation2] sm:$0x1] %vm183_vm0, %v199_v24  ;;  %v214_v26 = vadd.f32 %v213_v25, %v202_v23 }
  0x2e   : > { %215 = vst.msk [vmem:[#allocation3] sm:$0x1] %vm183_vm0, %v214_v26 }
  0x33   : > { %v219_v27 = vld [vmem:[#allocation2] sm:$0x1] }
  0x34   : > { %v220_v28 = vmul.f32 0.0625, %v219_v27 }
  0x35   : > { %v221_v29 = vld [vmem:[#allocation3] sm:$0x1] }
  0x36   : > { %v222_v30 = vmul.f32 0.0625, %v221_v29  ;;  %v223_v31 = vmul.f32 %v220_v28, %v220_v28  ;;  %239 = vst.msk [vmem:[%s162_s4] sm:$0x1] %vm183_vm0, %v220_v28 }
  0x37   : > { %468 = shalt.err (!%p465_p5)
}
  0x38   : > { %378 = dma.vmem_to_hbm [thread:$0]  (%p609_p4), %s257_s5, 16, %s259_s6, %s242_s7   ;;  %v224_v32 = vsub.f32 %v222_v30, %v223_v31 }
  0x39   : > { %s267_s27 = scalar_lea.hbm %s694_s2, %s543_s12  ;;  %s168_s29 = scalar_lea.vmem [#allocation6], %s633_s28 }
  0x3a   : > { %v225_v33 = vmax.f32 %v224_v32, 0.0  ;;  %s269_s30 = sshll.u32 %s168_s29, 4  ;;  %s271_s3 = sshll.u32 %s267_s27, 4  ;;  %s270_s30 = int_to_ptr.vmem [resolvable:$true] %s269_s30  ;;  %s272_s3 = int_to_ptr.hbm [resolvable:$true] %s271_s3 }
  0x3b   : > { %s246_s4 = scalar_lea.sflag [#allocation7], %s633_s28  ;;  %s483_s5 = sshra.s32 %s272_s3, 4  ;;  %s484_s5 = int_to_ptr.hbm [resolvable:$true] %s483_s5 }
  0x3c   : > { %v226_v34 = vadd.f32 1e-05, %v225_v33  ;;  %s485_s6 = scalar_lea.hbm %s484_s5, 1  ;;  %s489_s8 = scalar_lea.hbm %s694_s2, 2 }
  0x3d   : > { %p486_p6 = scmp.ne.s32.totalorder %s484_s5, %s485_s6  ;;  %p490_p10 = scmp.lt.s32.totalorder %s484_s5, %s694_s2 }
  0x3e   : > { %439 = vrsqrt.f32 %v226_v34  ;;  %vm234_vm2 = vcmp.eq.f32.partialorder %v226_v34, inf  ;;  %v237_v42 = vand.u32 2147483648, %v226_v34  ;;  %vm236_vm3 = vcmp.eq.f32.partialorder %v226_v34, 0.0  ;;  %p491_p11 = scmp.lt.s32.totalorder %s489_s8, %s485_s6 }
  0x3f   : > { %p487_p7 = pnand %p486_p6, %p609_p4 }
  0x40   : > { %p492_p12 = por %p491_p11, %p490_p10 }
  0x41   : > { %p488_p9 = pneg %p487_p7 }
  0x43   : > { %p493_p13 = pnand %p492_p12, %p488_p9 }
  0x44   : > { %v440_v35 = vpop.eup %439 }
  0x45   : > { %v228_v36 = vmul.f32 %v440_v35, %v226_v34 }
  0x47   : > { %v229_v37 = vmul.f32 %v440_v35, %v228_v36 }
  0x49   : > { %v230_v38 = vmul.f32 0.5, %v229_v37 }
  0x4b   : > { %v231_v39 = vsub.f32 1.5, %v230_v38 }
  0x4d   : > { %v232_v40 = vmul.f32 %v440_v35, %v231_v39 }
  0x4f   : > { %v233_v41 = vmul.f32 %v232_v40, %v226_v34 }
  0x51   : > { %v235_v43 = vsel %vm234_vm2, %v226_v34, %v233_v41 }
  0x52   : > { %v238_v44 = vsel %vm236_vm3, %v237_v42, %v235_v43 }
  0x53   : > { %240 = vst.msk [vmem:[%s168_s29] sm:$0x1] %vm183_vm0, %v238_v44 }
  0x54   : > { %496 = shalt.err (!%p493_p13)
}
  0x55   : > { %379 = dma.vmem_to_hbm [thread:$0]  (%p609_p4), %s270_s30, 16, %s272_s3, %s246_s4  }
  0x56 PF: > { %p389_p0 = scmp.ge.s32.totalorder %s551_s14, 2  ;;  %s283_s28 = sand.u32 1, %s531_s9  }
  0x57   : > { %s284_s18 = scalar_lea.sflag [#allocation5], %s283_s28 }
  0x58   : > { %p383_p1 = pnand %p389_p0, %p616_p8 }
  0x5a   : > { %p384_p2 = pneg %p383_p1 }
  0x5c   : > { %522 = dma.done.wait (%p384_p2), %s284_s18, 16  }
  0x5d   : > { %524 = vsyncadd (%p384_p2), %s284_s18, 4294967280  ;;  %s293_s20 = scalar_lea.sflag [#allocation7], %s283_s28 }
  0x5e   : > { %526 = dma.done.wait (%p384_p2), %s293_s20, 16  }
  0x5f   : > { %528 = vsyncadd (%p384_p2), %s293_s20, 4294967280  ;;  %s19_s14 = sadd.s32 1, %s551_s14   ;;  %s697_s9 = smov %s535_s10 }
  0x60   : > { %p16_p3 = scmp.ge.s32.totalorder %s19_s14, 4   ;;  %s698_s10 = smov %s539_s11 }
  0x61   : > { %s699_s11 = smov %s622_s22  ;;  %s700_s12 = smov %s547_s13 }
  0x62   : > { %s701_s13 = smov %s703_s17  ;;  %18 = sbr.rel (!%p16_p3) target bundleno = 6 (0x6), region = 84 }
  0x67   :  { %298 = vsyncpa [#allocation5], 1 }
  0x68   :  { %300 = vsyncpa [#allocation5 + $0x1], 1 }
  0x69   :  { %301 = vsyncpa [#allocation7], 1 }
  0x6a   :  { %303 = vsyncpa [#allocation7 + $0x1], 1 }

</bundles_post_ra>
